<compile_context>
chip_gen: v6e
topology: v6e:2x2x1
jax: 0.10.0
libtpu: 0.0.40
codegen_flags: <defaults>
</compile_context>

<pallas_src>
import functools

import jax
import jax.numpy as jnp
from jax.experimental import pallas as pl
from jax.experimental.pallas import tpu as pltpu


_VMEM_LIMIT = 48 * 1024 * 1024  # <= 64 MiB physical on v7x, well under v5e/v6e


def _row_tile(n, pref=256):
    # Row tile for the "parallel" grid axis: multiple of 8 (sublane) or full N.
    for t in (pref, 128, 64, 32, 16, 8):
        if t <= n and n % t == 0:
            return t
    return n


def _k_tile(n, pref=512):
    # K-reduction tile for streaming adj columns: multiple of 128 (lane) or full N.
    for t in (pref, 256, 128):
        if t <= n and n % t == 0:
            return t
    return n


# ----------------------------------------------------------------------------
# Kernel 1: fused autoencoder (enc_1..x_bar) + first GNN support (x @ W_gnn1)
# ----------------------------------------------------------------------------

def _ae_kernel(x_ref,
               ew1_ref, eb1_ref, ew2_ref, eb2_ref, ew3_ref, eb3_ref,
               zw_ref, zb_ref,
               dw1_ref, db1_ref, dw2_ref, db2_ref, dw3_ref, db3_ref,
               xw_ref, xb_ref,
               gw1_ref,
               xbar_ref, h1_ref, h2_ref, h3_ref, z_ref, sup1_ref):
    x = x_ref[...]

    def lin(a, w_ref, b_ref, relu):
        y = jnp.dot(a, w_ref[...], preferred_element_type=jnp.float32) + b_ref[...]
        return jnp.maximum(y, 0.0) if relu else y

    h1 = lin(x, ew1_ref, eb1_ref, True)
    h2 = lin(h1, ew2_ref, eb2_ref, True)
    h3 = lin(h2, ew3_ref, eb3_ref, True)
    z = lin(h3, zw_ref, zb_ref, False)
    d1 = lin(z, dw1_ref, db1_ref, True)
    d2 = lin(d1, dw2_ref, db2_ref, True)
    d3 = lin(d2, dw3_ref, db3_ref, True)
    x_bar = lin(d3, xw_ref, xb_ref, False)

    xbar_ref[...] = x_bar
    h1_ref[...] = h1
    h2_ref[...] = h2
    h3_ref[...] = h3
    z_ref[...] = z
    # support_1 = x @ W_gnn1 fused here: the x row tile is already resident.
    sup1_ref[...] = jnp.dot(x, gw1_ref[...], preferred_element_type=jnp.float32)


def ae_forward(x, p):
    n, n_input = x.shape
    tm = _row_tile(n)
    grid = (n // tm,)

    w_names = ("enc_1", "enc_2", "enc_3", "z", "dec_1", "dec_2", "dec_3", "x_bar")
    args = [x]
    in_specs = [pl.BlockSpec((tm, n_input), lambda i: (i, 0))]
    for name in w_names:
        w = p[f"{name}_w"]
        b = p[f"{name}_b"].reshape(1, -1)
        args += [w, b]
        # Constant block index -> weights/biases stay resident in VMEM.
        in_specs += [pl.BlockSpec(w.shape, lambda i: (0, 0)),
                     pl.BlockSpec(b.shape, lambda i: (0, 0))]
    gw1 = p["gnn_1_w"]
    args.append(gw1)
    in_specs.append(pl.BlockSpec(gw1.shape, lambda i: (0, 0)))

    out_dims = (n_input,
                p["enc_1_w"].shape[1], p["enc_2_w"].shape[1], p["enc_3_w"].shape[1],
                p["z_w"].shape[1], gw1.shape[1])
    out_shape = tuple(jax.ShapeDtypeStruct((n, d), jnp.float32) for d in out_dims)
    out_specs = tuple(pl.BlockSpec((tm, d), lambda i: (i, 0)) for d in out_dims)

    return pl.pallas_call(
        _ae_kernel,
        out_shape=out_shape,
        grid_spec=pltpu.PrefetchScalarGridSpec(
            num_scalar_prefetch=0,
            grid=grid,
            in_specs=in_specs,
            out_specs=out_specs,
        ),
        compiler_params=pltpu.CompilerParams(
            dimension_semantics=("parallel",),
            vmem_limit_bytes=_VMEM_LIMIT,
        ),
    )(*args)


# ----------------------------------------------------------------------------
# Kernel 2: chained GNN layer.
#   acc = adj @ support_l          (tiled K reduction, f32 accumulator)
#   epilogue: h_l = relu(acc); support_{l+1} = ((1-sigma) h_l + sigma tra_l) @ W_{l+1}
# ----------------------------------------------------------------------------

def _gnn_chain_kernel(adj_ref, sup_ref, tra_ref, wnext_ref, out_ref, acc_ref, *, sigma):
    k = pl.program_id(1)

    @pl.when(k == 0)
    def _init():
        acc_ref[...] = jnp.zeros_like(acc_ref)

    acc_ref[...] += jnp.dot(adj_ref[...], sup_ref[...],
                            preferred_element_type=jnp.float32)

    @pl.when(k == pl.num_programs(1) - 1)
    def _epilogue():
        h = jnp.maximum(acc_ref[...], 0.0)                 # GNN layer ReLU (active=True)
        feat = (1.0 - sigma) * h + sigma * tra_ref[...]    # sigma mix
        out_ref[...] = jnp.dot(feat, wnext_ref[...],
                               preferred_element_type=jnp.float32)


def gnn_chain(adj, support, tra, w_next, *, sigma):
    n = adj.shape[0]
    f_sup = support.shape[1]
    f_tra = tra.shape[1]
    f_next = w_next.shape[1]
    assert f_tra == f_sup
    tm = _row_tile(n)
    tk = _k_tile(n)
    grid = (n // tm, n // tk)
    return pl.pallas_call(
        functools.partial(_gnn_chain_kernel, sigma=sigma),
        out_shape=jax.ShapeDtypeStruct((n, f_next), jnp.float32),
        grid_spec=pltpu.PrefetchScalarGridSpec(
            num_scalar_prefetch=0,
            grid=grid,
            in_specs=[
                pl.BlockSpec((tm, tk), lambda i, k: (i, k)),          # adj (streamed)
                pl.BlockSpec((tk, f_sup), lambda i, k: (k, 0)),       # support k-slice
                pl.BlockSpec((tm, f_tra), lambda i, k: (i, 0)),       # AE activation row tile
                pl.BlockSpec((f_sup, f_next), lambda i, k: (0, 0)),   # next-layer GNN weight
            ],
            out_specs=pl.BlockSpec((tm, f_next), lambda i, k: (i, 0)),
            scratch_shapes=[pltpu.VMEM((tm, f_sup), jnp.float32)],
        ),
        compiler_params=pltpu.CompilerParams(
            dimension_semantics=("parallel", "arbitrary"),
            vmem_limit_bytes=_VMEM_LIMIT,
        ),
    )(adj, support, tra, w_next)


# ----------------------------------------------------------------------------
# Kernel 3: last GNN layer (no ReLU) + fused row softmax + student-t q.
# ----------------------------------------------------------------------------

def _gnn_final_kernel(adj_ref, sup_ref, z_ref, ct_ref, pred_ref, q_ref, acc_ref, *, v):
    k = pl.program_id(1)

    @pl.when(k == 0)
    def _init():
        acc_ref[...] = jnp.zeros_like(acc_ref)

    acc_ref[...] += jnp.dot(adj_ref[...], sup_ref[...],
                            preferred_element_type=jnp.float32)

    @pl.when(k == pl.num_programs(1) - 1)
    def _epilogue():
        # predict = softmax(h, dim=1); last GNN layer has active=False (no ReLU).
        h = acc_ref[...]
        m = jnp.max(h, axis=1, keepdims=True)
        e = jnp.exp(h - m)
        pred_ref[...] = e * pl.reciprocal(jnp.sum(e, axis=1, keepdims=True),
                                          approx=True)

        # q_{nk} = (1 + ||z_n - c_k||^2 / v)^-1  via one MXU matmul:
        #   ||z - c||^2 = ||z||^2 + ||c||^2 - 2 z . c
        z = z_ref[...]                                   # [tm, n_z]
        ct = ct_ref[...]                                 # [n_z, K] (pre-transposed)
        zz = jnp.sum(z * z, axis=1, keepdims=True)       # [tm, 1]
        cc = jnp.sum(ct * ct, axis=0, keepdims=True)     # [1, K]
        d = zz + cc - 2.0 * jnp.dot(z, ct, preferred_element_type=jnp.float32)
        d = jnp.maximum(d, 0.0)
        q = 1.0 / (1.0 + d / v)
        expo = (v + 1.0) / 2.0
        if expo != 1.0:
            q = q ** expo
        q_ref[...] = q * pl.reciprocal(jnp.sum(q, axis=1, keepdims=True),
                                       approx=True)


def gnn_final(adj, support, z, cluster_layer, *, v):
    n = adj.shape[0]
    f_sup = support.shape[1]           # = n_clusters
    n_z = z.shape[1]
    n_clusters = cluster_layer.shape[0]
    tm = _row_tile(n)
    tk = _k_tile(n)
    grid = (n // tm, n // tk)
    c_t = jnp.transpose(cluster_layer)  # [n_z, K], transposed outside the kernel
    return pl.pallas_call(
        functools.partial(_gnn_final_kernel, v=v),
        out_shape=(jax.ShapeDtypeStruct((n, n_clusters), jnp.float32),   # predict
                   jax.ShapeDtypeStruct((n, n_clusters), jnp.float32)),  # q
        grid_spec=pltpu.PrefetchScalarGridSpec(
            num_scalar_prefetch=0,
            grid=grid,
            in_specs=[
                pl.BlockSpec((tm, tk), lambda i, k: (i, k)),            # adj (streamed)
                pl.BlockSpec((tk, f_sup), lambda i, k: (k, 0)),         # support_5 k-slice
                pl.BlockSpec((tm, n_z), lambda i, k: (i, 0)),           # z row tile
                pl.BlockSpec((n_z, n_clusters), lambda i, k: (0, 0)),   # cluster centers^T
            ],
            out_specs=(pl.BlockSpec((tm, n_clusters), lambda i, k: (i, 0)),
                       pl.BlockSpec((tm, n_clusters), lambda i, k: (i, 0))),
            scratch_shapes=[pltpu.VMEM((tm, f_sup), jnp.float32)],
        ),
        compiler_params=pltpu.CompilerParams(
            dimension_semantics=("parallel", "arbitrary"),
            vmem_limit_bytes=_VMEM_LIMIT,
        ),
    )(adj, support, z, c_t)


# ----------------------------------------------------------------------------
# SDCN forward (6 pallas_calls total: 1 AE + 5 GNN)
# ----------------------------------------------------------------------------

def sdcn_forward(params, x, adj, *, sigma=0.5, v=1.0):
    p = params
    n = x.shape[0]

    # AE (all 8 linears fused) + support_1 = x @ W_gnn1
    x_bar, enc_h1, enc_h2, enc_h3, z, sup1 = ae_forward(x, p)

    # GCN path with sigma mixing; each call emits the NEXT layer's support.
    sup2 = gnn_chain(adj, sup1, enc_h1, p["gnn_2_w"], sigma=sigma)   # layer 1 -> support_2
    sup3 = gnn_chain(adj, sup2, enc_h2, p["gnn_3_w"], sigma=sigma)   # layer 2 -> support_3
    sup4 = gnn_chain(adj, sup3, enc_h3, p["gnn_4_w"], sigma=sigma)   # layer 3 -> support_4
    sup5 = gnn_chain(adj, sup4, z,      p["gnn_5_w"], sigma=sigma)   # layer 4 -> support_5

    # Layer 5 (no ReLU) + softmax + student-t q fused in the epilogue.
    predict, q = gnn_final(adj, sup5, z, p["cluster_layer"], v=v)

    gcn_shapes = {
        "Layer 1": (n, p["gnn_1_w"].shape[1]),
        "Layer 2": (n, p["gnn_2_w"].shape[1]),
        "Layer 3": (n, p["gnn_3_w"].shape[1]),
        "Layer 4": (n, p["gnn_4_w"].shape[1]),
        "Layer 5": (n, p["gnn_5_w"].shape[1]),
    }

    # TODO(synk): training-time epoch logging (prints) and pretrained-AE
    # checkpoint loading from the PyTorch module are host-side bookkeeping and
    # are intentionally not reproduced in-kernel.
    return x_bar, q, predict, z, gcn_shapes


# ----------------------------------------------------------------------------
# Deterministic parameter initialization (synthetic, no checkpoint loading)
# ----------------------------------------------------------------------------

def init_params(key, *, n_enc_1, n_enc_2, n_enc_3, n_dec_1, n_dec_2, n_dec_3,
                n_input, n_z, n_clusters):
    dims = {
        "enc_1": (n_input, n_enc_1), "enc_2": (n_enc_1, n_enc_2),
        "enc_3": (n_enc_2, n_enc_3), "z":     (n_enc_3, n_z),
        "dec_1": (n_z, n_dec_1),     "dec_2": (n_dec_1, n_dec_2),
        "dec_3": (n_dec_2, n_dec_3), "x_bar": (n_dec_3, n_input),
    }
    gnn_dims = {
        "gnn_1": (n_input, n_enc_1), "gnn_2": (n_enc_1, n_enc_2),
        "gnn_3": (n_enc_2, n_enc_3), "gnn_4": (n_enc_3, n_z),
        "gnn_5": (n_z, n_clusters),
    }
    params = {}
    keys = jax.random.split(key, len(dims) + len(gnn_dims) + 1)
    ki = 0
    for name, (din, dout) in dims.items():
        scale = (2.0 / (din + dout)) ** 0.5
        params[f"{name}_w"] = scale * jax.random.normal(keys[ki], (din, dout), jnp.float32)
        params[f"{name}_b"] = jnp.zeros((dout,), jnp.float32)
        ki += 1
    for name, (din, dout) in gnn_dims.items():
        scale = (2.0 / (din + dout)) ** 0.5
        params[f"{name}_w"] = scale * jax.random.normal(keys[ki], (din, dout), jnp.float32)
        ki += 1
    scale = (2.0 / (n_clusters + n_z)) ** 0.5
    params["cluster_layer"] = scale * jax.random.normal(keys[ki], (n_clusters, n_z), jnp.float32)
    return params


# ----------------------------------------------------------------------------
# Demo
# ----------------------------------------------------------------------------

if __name__ == "__main__":
    N = 8           # number of graph nodes / samples
    n_input = 32
    n_enc_1, n_enc_2, n_enc_3 = 16, 16, 32
    n_dec_1, n_dec_2, n_dec_3 = 32, 16, 16
    n_z = 8
    n_clusters = 4

    key = jax.random.PRNGKey(0)
    k_p, k_x, k_a = jax.random.split(key, 3)

    params = init_params(
        k_p, n_enc_1=n_enc_1, n_enc_2=n_enc_2, n_enc_3=n_enc_3,
        n_dec_1=n_dec_1, n_dec_2=n_dec_2, n_dec_3=n_dec_3,
        n_input=n_input, n_z=n_z, n_clusters=n_clusters)

    x = jax.random.normal(k_x, (N, n_input), jnp.float32)

    # Dense row-normalized adjacency (self-loops + random edges).
    a_raw = (jax.random.uniform(k_a, (N, N)) > 0.7).astype(jnp.float32)
    a_raw = a_raw + a_raw.T + jnp.eye(N, dtype=jnp.float32)
    a_raw = jnp.minimum(a_raw, 1.0)
    adj = a_raw / jnp.sum(a_raw, axis=1, keepdims=True)

    x_bar, q, predict, z, gcn_shapes = sdcn_forward(params, x, adj, sigma=0.5, v=1.0)

    jax.block_until_ready((x_bar, q, predict, z))

    assert x_bar.shape == (N, n_input)
    assert q.shape == (N, n_clusters)
    assert predict.shape == (N, n_clusters)
    assert z.shape == (N, n_z)

    print("KERNEL_OK")
</pallas_src>

<mosaic_0001>
module attributes {stable_mosaic.version = 11 : i64} {
  func.func @_ae_kernel(%arg0: i32, %arg1: memref<8x32xf32, #tpu.memory_space<vmem>>, %arg2: memref<32x16xf32, #tpu.memory_space<vmem>>, %arg3: memref<1x16xf32, #tpu.memory_space<vmem>>, %arg4: memref<16x16xf32, #tpu.memory_space<vmem>>, %arg5: memref<1x16xf32, #tpu.memory_space<vmem>>, %arg6: memref<16x32xf32, #tpu.memory_space<vmem>>, %arg7: memref<1x32xf32, #tpu.memory_space<vmem>>, %arg8: memref<32x8xf32, #tpu.memory_space<vmem>>, %arg9: memref<1x8xf32, #tpu.memory_space<vmem>>, %arg10: memref<8x32xf32, #tpu.memory_space<vmem>>, %arg11: memref<1x32xf32, #tpu.memory_space<vmem>>, %arg12: memref<32x16xf32, #tpu.memory_space<vmem>>, %arg13: memref<1x16xf32, #tpu.memory_space<vmem>>, %arg14: memref<16x16xf32, #tpu.memory_space<vmem>>, %arg15: memref<1x16xf32, #tpu.memory_space<vmem>>, %arg16: memref<16x32xf32, #tpu.memory_space<vmem>>, %arg17: memref<1x32xf32, #tpu.memory_space<vmem>>, %arg18: memref<32x16xf32, #tpu.memory_space<vmem>>, %arg19: memref<8x32xf32, #tpu.memory_space<vmem>>, %arg20: memref<8x16xf32, #tpu.memory_space<vmem>>, %arg21: memref<8x16xf32, #tpu.memory_space<vmem>>, %arg22: memref<8x32xf32, #tpu.memory_space<vmem>>, %arg23: memref<8x8xf32, #tpu.memory_space<vmem>>, %arg24: memref<8x16xf32, #tpu.memory_space<vmem>>) attributes {dimension_semantics = [#tpu.dimension_semantics<parallel>], iteration_bounds = array<i64: 1>, scalar_prefetch = 0 : i64, scratch_operands = 0 : i64, tpu.core_type = #tpu.core_type<tc>, window_params = [{transform_indices = @transform_0, window_bounds = array<i64: 8, 32>}, {pipeline_mode = #tpu.pipeline_mode<synchronous>, transform_indices = @transform_1, window_bounds = array<i64: 32, 16>}, {pipeline_mode = #tpu.pipeline_mode<synchronous>, transform_indices = @transform_2, window_bounds = array<i64: 1, 16>}, {pipeline_mode = #tpu.pipeline_mode<synchronous>, transform_indices = @transform_3, window_bounds = array<i64: 16, 16>}, {pipeline_mode = #tpu.pipeline_mode<synchronous>, transform_indices = @transform_4, window_bounds = array<i64: 1, 16>}, {pipeline_mode = #tpu.pipeline_mode<synchronous>, transform_indices = @transform_5, window_bounds = array<i64: 16, 32>}, {pipeline_mode = #tpu.pipeline_mode<synchronous>, transform_indices = @transform_6, window_bounds = array<i64: 1, 32>}, {pipeline_mode = #tpu.pipeline_mode<synchronous>, transform_indices = @transform_7, window_bounds = array<i64: 32, 8>}, {pipeline_mode = #tpu.pipeline_mode<synchronous>, transform_indices = @transform_8, window_bounds = array<i64: 1, 8>}, {pipeline_mode = #tpu.pipeline_mode<synchronous>, transform_indices = @transform_9, window_bounds = array<i64: 8, 32>}, {pipeline_mode = #tpu.pipeline_mode<synchronous>, transform_indices = @transform_10, window_bounds = array<i64: 1, 32>}, {pipeline_mode = #tpu.pipeline_mode<synchronous>, transform_indices = @transform_11, window_bounds = array<i64: 32, 16>}, {pipeline_mode = #tpu.pipeline_mode<synchronous>, transform_indices = @transform_12, window_bounds = array<i64: 1, 16>}, {pipeline_mode = #tpu.pipeline_mode<synchronous>, transform_indices = @transform_13, window_bounds = array<i64: 16, 16>}, {pipeline_mode = #tpu.pipeline_mode<synchronous>, transform_indices = @transform_14, window_bounds = array<i64: 1, 16>}, {pipeline_mode = #tpu.pipeline_mode<synchronous>, transform_indices = @transform_15, window_bounds = array<i64: 16, 32>}, {pipeline_mode = #tpu.pipeline_mode<synchronous>, transform_indices = @transform_16, window_bounds = array<i64: 1, 32>}, {pipeline_mode = #tpu.pipeline_mode<synchronous>, transform_indices = @transform_17, window_bounds = array<i64: 32, 16>}, {transform_indices = @transform_18, window_bounds = array<i64: 8, 32>}, {transform_indices = @transform_19, window_bounds = array<i64: 8, 16>}, {transform_indices = @transform_20, window_bounds = array<i64: 8, 16>}, {transform_indices = @transform_21, window_bounds = array<i64: 8, 32>}, {transform_indices = @transform_22, window_bounds = array<i64: 8, 8>}, {transform_indices = @transform_23, window_bounds = array<i64: 8, 16>}]} {
    %c0 = arith.constant 0 : index
    %c0_0 = arith.constant 0 : index
    %0 = vector.load %arg1[%c0, %c0_0] : memref<8x32xf32, #tpu.memory_space<vmem>>, vector<8x32xf32>
    %c0_1 = arith.constant 0 : index
    %c0_2 = arith.constant 0 : index
    %1 = vector.load %arg2[%c0_1, %c0_2] : memref<32x16xf32, #tpu.memory_space<vmem>>, vector<32x16xf32>
    %cst = arith.constant dense<0.000000e+00> : vector<8x16xf32>
    %2 = tpu.matmul %0, %1, %cst {dimension_numbers = #tpu.dot_dimension_numbers<[1], [0], [0], [1], [0, 0, 1, 1], [], []>} : vector<8x32xf32>, vector<32x16xf32>, vector<8x16xf32> -> vector<8x16xf32>
    %c0_3 = arith.constant 0 : index
    %c0_4 = arith.constant 0 : index
    %3 = vector.load %arg3[%c0_3, %c0_4] : memref<1x16xf32, #tpu.memory_space<vmem>>, vector<1x16xf32>
    %4 = vector.broadcast %3 : vector<1x16xf32> to vector<8x16xf32>
    %5 = arith.addf %2, %4 : vector<8x16xf32>
    %cst_5 = arith.constant 0.000000e+00 : f32
    %6 = vector.broadcast %cst_5 : f32 to vector<8x16xf32>
    %7 = arith.maximumf %5, %6 : vector<8x16xf32>
    %c0_6 = arith.constant 0 : index
    %c0_7 = arith.constant 0 : index
    %8 = vector.load %arg4[%c0_6, %c0_7] : memref<16x16xf32, #tpu.memory_space<vmem>>, vector<16x16xf32>
    %cst_8 = arith.constant dense<0.000000e+00> : vector<8x16xf32>
    %9 = tpu.matmul %7, %8, %cst_8 {dimension_numbers = #tpu.dot_dimension_numbers<[1], [0], [0], [1], [0, 0, 1, 1], [], []>} : vector<8x16xf32>, vector<16x16xf32>, vector<8x16xf32> -> vector<8x16xf32>
    %c0_9 = arith.constant 0 : index
    %c0_10 = arith.constant 0 : index
    %10 = vector.load %arg5[%c0_9, %c0_10] : memref<1x16xf32, #tpu.memory_space<vmem>>, vector<1x16xf32>
    %11 = vector.broadcast %10 : vector<1x16xf32> to vector<8x16xf32>
    %12 = arith.addf %9, %11 : vector<8x16xf32>
    %cst_11 = arith.constant 0.000000e+00 : f32
    %13 = vector.broadcast %cst_11 : f32 to vector<8x16xf32>
    %14 = arith.maximumf %12, %13 : vector<8x16xf32>
    %c0_12 = arith.constant 0 : index
    %c0_13 = arith.constant 0 : index
    %15 = vector.load %arg6[%c0_12, %c0_13] : memref<16x32xf32, #tpu.memory_space<vmem>>, vector<16x32xf32>
    %cst_14 = arith.constant dense<0.000000e+00> : vector<8x32xf32>
    %16 = tpu.matmul %14, %15, %cst_14 {dimension_numbers = #tpu.dot_dimension_numbers<[1], [0], [0], [1], [0, 0, 1, 1], [], []>} : vector<8x16xf32>, vector<16x32xf32>, vector<8x32xf32> -> vector<8x32xf32>
    %c0_15 = arith.constant 0 : index
    %c0_16 = arith.constant 0 : index
    %17 = vector.load %arg7[%c0_15, %c0_16] : memref<1x32xf32, #tpu.memory_space<vmem>>, vector<1x32xf32>
    %18 = vector.broadcast %17 : vector<1x32xf32> to vector<8x32xf32>
    %19 = arith.addf %16, %18 : vector<8x32xf32>
    %cst_17 = arith.constant 0.000000e+00 : f32
    %20 = vector.broadcast %cst_17 : f32 to vector<8x32xf32>
    %21 = arith.maximumf %19, %20 : vector<8x32xf32>
    %c0_18 = arith.constant 0 : index
    %c0_19 = arith.constant 0 : index
    %22 = vector.load %arg8[%c0_18, %c0_19] : memref<32x8xf32, #tpu.memory_space<vmem>>, vector<32x8xf32>
    %cst_20 = arith.constant dense<0.000000e+00> : vector<8x8xf32>
    %23 = tpu.matmul %21, %22, %cst_20 {dimension_numbers = #tpu.dot_dimension_numbers<[1], [0], [0], [1], [0, 0, 1, 1], [], []>} : vector<8x32xf32>, vector<32x8xf32>, vector<8x8xf32> -> vector<8x8xf32>
    %c0_21 = arith.constant 0 : index
    %c0_22 = arith.constant 0 : index
    %24 = vector.load %arg9[%c0_21, %c0_22] : memref<1x8xf32, #tpu.memory_space<vmem>>, vector<1x8xf32>
    %25 = vector.broadcast %24 : vector<1x8xf32> to vector<8x8xf32>
    %26 = arith.addf %23, %25 : vector<8x8xf32>
    %c0_23 = arith.constant 0 : index
    %c0_24 = arith.constant 0 : index
    %27 = vector.load %arg10[%c0_23, %c0_24] : memref<8x32xf32, #tpu.memory_space<vmem>>, vector<8x32xf32>
    %cst_25 = arith.constant dense<0.000000e+00> : vector<8x32xf32>
    %28 = tpu.matmul %26, %27, %cst_25 {dimension_numbers = #tpu.dot_dimension_numbers<[1], [0], [0], [1], [0, 0, 1, 1], [], []>} : vector<8x8xf32>, vector<8x32xf32>, vector<8x32xf32> -> vector<8x32xf32>
    %c0_26 = arith.constant 0 : index
    %c0_27 = arith.constant 0 : index
    %29 = vector.load %arg11[%c0_26, %c0_27] : memref<1x32xf32, #tpu.memory_space<vmem>>, vector<1x32xf32>
    %30 = vector.broadcast %29 : vector<1x32xf32> to vector<8x32xf32>
    %31 = arith.addf %28, %30 : vector<8x32xf32>
    %cst_28 = arith.constant 0.000000e+00 : f32
    %32 = vector.broadcast %cst_28 : f32 to vector<8x32xf32>
    %33 = arith.maximumf %31, %32 : vector<8x32xf32>
    %c0_29 = arith.constant 0 : index
    %c0_30 = arith.constant 0 : index
    %34 = vector.load %arg12[%c0_29, %c0_30] : memref<32x16xf32, #tpu.memory_space<vmem>>, vector<32x16xf32>
    %cst_31 = arith.constant dense<0.000000e+00> : vector<8x16xf32>
    %35 = tpu.matmul %33, %34, %cst_31 {dimension_numbers = #tpu.dot_dimension_numbers<[1], [0], [0], [1], [0, 0, 1, 1], [], []>} : vector<8x32xf32>, vector<32x16xf32>, vector<8x16xf32> -> vector<8x16xf32>
    %c0_32 = arith.constant 0 : index
    %c0_33 = arith.constant 0 : index
    %36 = vector.load %arg13[%c0_32, %c0_33] : memref<1x16xf32, #tpu.memory_space<vmem>>, vector<1x16xf32>
    %37 = vector.broadcast %36 : vector<1x16xf32> to vector<8x16xf32>
    %38 = arith.addf %35, %37 : vector<8x16xf32>
    %cst_34 = arith.constant 0.000000e+00 : f32
    %39 = vector.broadcast %cst_34 : f32 to vector<8x16xf32>
    %40 = arith.maximumf %38, %39 : vector<8x16xf32>
    %c0_35 = arith.constant 0 : index
    %c0_36 = arith.constant 0 : index
    %41 = vector.load %arg14[%c0_35, %c0_36] : memref<16x16xf32, #tpu.memory_space<vmem>>, vector<16x16xf32>
    %cst_37 = arith.constant dense<0.000000e+00> : vector<8x16xf32>
    %42 = tpu.matmul %40, %41, %cst_37 {dimension_numbers = #tpu.dot_dimension_numbers<[1], [0], [0], [1], [0, 0, 1, 1], [], []>} : vector<8x16xf32>, vector<16x16xf32>, vector<8x16xf32> -> vector<8x16xf32>
    %c0_38 = arith.constant 0 : index
    %c0_39 = arith.constant 0 : index
    %43 = vector.load %arg15[%c0_38, %c0_39] : memref<1x16xf32, #tpu.memory_space<vmem>>, vector<1x16xf32>
    %44 = vector.broadcast %43 : vector<1x16xf32> to vector<8x16xf32>
    %45 = arith.addf %42, %44 : vector<8x16xf32>
    %cst_40 = arith.constant 0.000000e+00 : f32
    %46 = vector.broadcast %cst_40 : f32 to vector<8x16xf32>
    %47 = arith.maximumf %45, %46 : vector<8x16xf32>
    %c0_41 = arith.constant 0 : index
    %c0_42 = arith.constant 0 : index
    %48 = vector.load %arg16[%c0_41, %c0_42] : memref<16x32xf32, #tpu.memory_space<vmem>>, vector<16x32xf32>
    %cst_43 = arith.constant dense<0.000000e+00> : vector<8x32xf32>
    %49 = tpu.matmul %47, %48, %cst_43 {dimension_numbers = #tpu.dot_dimension_numbers<[1], [0], [0], [1], [0, 0, 1, 1], [], []>} : vector<8x16xf32>, vector<16x32xf32>, vector<8x32xf32> -> vector<8x32xf32>
    %c0_44 = arith.constant 0 : index
    %c0_45 = arith.constant 0 : index
    %50 = vector.load %arg17[%c0_44, %c0_45] : memref<1x32xf32, #tpu.memory_space<vmem>>, vector<1x32xf32>
    %51 = vector.broadcast %50 : vector<1x32xf32> to vector<8x32xf32>
    %52 = arith.addf %49, %51 : vector<8x32xf32>
    %c0_46 = arith.constant 0 : index
    %c0_47 = arith.constant 0 : index
    %53 = vector.load %arg19[%c0_46, %c0_47] : memref<8x32xf32, #tpu.memory_space<vmem>>, vector<8x32xf32>
    tpu.vector_store %arg19[%c0_46, %c0_47], %52 {strides = array<i32>} : memref<8x32xf32, #tpu.memory_space<vmem>>, vector<8x32xf32>,
    %c0_48 = arith.constant 0 : index
    %c0_49 = arith.constant 0 : index
    %54 = vector.load %arg20[%c0_48, %c0_49] : memref<8x16xf32, #tpu.memory_space<vmem>>, vector<8x16xf32>
    tpu.vector_store %arg20[%c0_48, %c0_49], %7 {strides = array<i32>} : memref<8x16xf32, #tpu.memory_space<vmem>>, vector<8x16xf32>,
    %c0_50 = arith.constant 0 : index
    %c0_51 = arith.constant 0 : index
    %55 = vector.load %arg21[%c0_50, %c0_51] : memref<8x16xf32, #tpu.memory_space<vmem>>, vector<8x16xf32>
    tpu.vector_store %arg21[%c0_50, %c0_51], %14 {strides = array<i32>} : memref<8x16xf32, #tpu.memory_space<vmem>>, vector<8x16xf32>,
    %c0_52 = arith.constant 0 : index
    %c0_53 = arith.constant 0 : index
    %56 = vector.load %arg22[%c0_52, %c0_53] : memref<8x32xf32, #tpu.memory_space<vmem>>, vector<8x32xf32>
    tpu.vector_store %arg22[%c0_52, %c0_53], %21 {strides = array<i32>} : memref<8x32xf32, #tpu.memory_space<vmem>>, vector<8x32xf32>,
    %c0_54 = arith.constant 0 : index
    %c0_55 = arith.constant 0 : index
    %57 = vector.load %arg23[%c0_54, %c0_55] : memref<8x8xf32, #tpu.memory_space<vmem>>, vector<8x8xf32>
    tpu.vector_store %arg23[%c0_54, %c0_55], %26 {strides = array<i32>} : memref<8x8xf32, #tpu.memory_space<vmem>>, vector<8x8xf32>,
    %c0_56 = arith.constant 0 : index
    %c0_57 = arith.constant 0 : index
    %58 = vector.load %arg18[%c0_56, %c0_57] : memref<32x16xf32, #tpu.memory_space<vmem>>, vector<32x16xf32>
    %cst_58 = arith.constant dense<0.000000e+00> : vector<8x16xf32>
    %59 = tpu.matmul %0, %58, %cst_58 {dimension_numbers = #tpu.dot_dimension_numbers<[1], [0], [0], [1], [0, 0, 1, 1], [], []>} : vector<8x32xf32>, vector<32x16xf32>, vector<8x16xf32> -> vector<8x16xf32>
    %c0_59 = arith.constant 0 : index
    %c0_60 = arith.constant 0 : index
    %60 = vector.load %arg24[%c0_59, %c0_60] : memref<8x16xf32, #tpu.memory_space<vmem>>, vector<8x16xf32>
    tpu.vector_store %arg24[%c0_59, %c0_60], %59 {strides = array<i32>} : memref<8x16xf32, #tpu.memory_space<vmem>>, vector<8x16xf32>,
    return
  }
  func.func @transform_0(%arg0: i32) -> (i32, i32) {
    %c0_i32 = arith.constant 0 : i32
    %c0_i32_0 = arith.constant 0 : i32
    return %arg0, %c0_i32 : i32, i32
  }
  func.func @transform_1(%arg0: i32) -> (i32, i32) {
    %c0_i32 = arith.constant 0 : i32
    %c0_i32_0 = arith.constant 0 : i32
    %c0_i32_1 = arith.constant 0 : i32
    return %c0_i32, %c0_i32_0 : i32, i32
  }
  func.func @transform_2(%arg0: i32) -> (i32, i32) {
    %c0_i32 = arith.constant 0 : i32
    %c0_i32_0 = arith.constant 0 : i32
    %c0_i32_1 = arith.constant 0 : i32
    return %c0_i32, %c0_i32_0 : i32, i32
  }
  func.func @transform_3(%arg0: i32) -> (i32, i32) {
    %c0_i32 = arith.constant 0 : i32
    %c0_i32_0 = arith.constant 0 : i32
    %c0_i32_1 = arith.constant 0 : i32
    return %c0_i32, %c0_i32_0 : i32, i32
  }
  func.func @transform_4(%arg0: i32) -> (i32, i32) {
    %c0_i32 = arith.constant 0 : i32
    %c0_i32_0 = arith.constant 0 : i32
    %c0_i32_1 = arith.constant 0 : i32
    return %c0_i32, %c0_i32_0 : i32, i32
  }
  func.func @transform_5(%arg0: i32) -> (i32, i32) {
    %c0_i32 = arith.constant 0 : i32
    %c0_i32_0 = arith.constant 0 : i32
    %c0_i32_1 = arith.constant 0 : i32
    return %c0_i32, %c0_i32_0 : i32, i32
  }
  func.func @transform_6(%arg0: i32) -> (i32, i32) {
    %c0_i32 = arith.constant 0 : i32
    %c0_i32_0 = arith.constant 0 : i32
    %c0_i32_1 = arith.constant 0 : i32
    return %c0_i32, %c0_i32_0 : i32, i32
  }
  func.func @transform_7(%arg0: i32) -> (i32, i32) {
    %c0_i32 = arith.constant 0 : i32
    %c0_i32_0 = arith.constant 0 : i32
    %c0_i32_1 = arith.constant 0 : i32
    return %c0_i32, %c0_i32_0 : i32, i32
  }
  func.func @transform_8(%arg0: i32) -> (i32, i32) {
    %c0_i32 = arith.constant 0 : i32
    %c0_i32_0 = arith.constant 0 : i32
    %c0_i32_1 = arith.constant 0 : i32
    return %c0_i32, %c0_i32_0 : i32, i32
  }
  func.func @transform_9(%arg0: i32) -> (i32, i32) {
    %c0_i32 = arith.constant 0 : i32
    %c0_i32_0 = arith.constant 0 : i32
    %c0_i32_1 = arith.constant 0 : i32
    return %c0_i32, %c0_i32_0 : i32, i32
  }
  func.func @transform_10(%arg0: i32) -> (i32, i32) {
    %c0_i32 = arith.constant 0 : i32
    %c0_i32_0 = arith.constant 0 : i32
    %c0_i32_1 = arith.constant 0 : i32
    return %c0_i32, %c0_i32_0 : i32, i32
  }
  func.func @transform_11(%arg0: i32) -> (i32, i32) {
    %c0_i32 = arith.constant 0 : i32
    %c0_i32_0 = arith.constant 0 : i32
    %c0_i32_1 = arith.constant 0 : i32
    return %c0_i32, %c0_i32_0 : i32, i32
  }
  func.func @transform_12(%arg0: i32) -> (i32, i32) {
    %c0_i32 = arith.constant 0 : i32
    %c0_i32_0 = arith.constant 0 : i32
    %c0_i32_1 = arith.constant 0 : i32
    return %c0_i32, %c0_i32_0 : i32, i32
  }
  func.func @transform_13(%arg0: i32) -> (i32, i32) {
    %c0_i32 = arith.constant 0 : i32
    %c0_i32_0 = arith.constant 0 : i32
    %c0_i32_1 = arith.constant 0 : i32
    return %c0_i32, %c0_i32_0 : i32, i32
  }
  func.func @transform_14(%arg0: i32) -> (i32, i32) {
    %c0_i32 = arith.constant 0 : i32
    %c0_i32_0 = arith.constant 0 : i32
    %c0_i32_1 = arith.constant 0 : i32
    return %c0_i32, %c0_i32_0 : i32, i32
  }
  func.func @transform_15(%arg0: i32) -> (i32, i32) {
    %c0_i32 = arith.constant 0 : i32
    %c0_i32_0 = arith.constant 0 : i32
    %c0_i32_1 = arith.constant 0 : i32
    return %c0_i32, %c0_i32_0 : i32, i32
  }
  func.func @transform_16(%arg0: i32) -> (i32, i32) {
    %c0_i32 = arith.constant 0 : i32
    %c0_i32_0 = arith.constant 0 : i32
    %c0_i32_1 = arith.constant 0 : i32
    return %c0_i32, %c0_i32_0 : i32, i32
  }
  func.func @transform_17(%arg0: i32) -> (i32, i32) {
    %c0_i32 = arith.constant 0 : i32
    %c0_i32_0 = arith.constant 0 : i32
    %c0_i32_1 = arith.constant 0 : i32
    return %c0_i32, %c0_i32_0 : i32, i32
  }
  func.func @transform_18(%arg0: i32) -> (i32, i32) {
    %c0_i32 = arith.constant 0 : i32
    %c0_i32_0 = arith.constant 0 : i32
    return %arg0, %c0_i32 : i32, i32
  }
  func.func @transform_19(%arg0: i32) -> (i32, i32) {
    %c0_i32 = arith.constant 0 : i32
    %c0_i32_0 = arith.constant 0 : i32
    return %arg0, %c0_i32 : i32, i32
  }
  func.func @transform_20(%arg0: i32) -> (i32, i32) {
    %c0_i32 = arith.constant 0 : i32
    %c0_i32_0 = arith.constant 0 : i32
    return %arg0, %c0_i32 : i32, i32
  }
  func.func @transform_21(%arg0: i32) -> (i32, i32) {
    %c0_i32 = arith.constant 0 : i32
    %c0_i32_0 = arith.constant 0 : i32
    return %arg0, %c0_i32 : i32, i32
  }
  func.func @transform_22(%arg0: i32) -> (i32, i32) {
    %c0_i32 = arith.constant 0 : i32
    %c0_i32_0 = arith.constant 0 : i32
    return %arg0, %c0_i32 : i32, i32
  }
  func.func @transform_23(%arg0: i32) -> (i32, i32) {
    %c0_i32 = arith.constant 0 : i32
    %c0_i32_0 = arith.constant 0 : i32
    return %arg0, %c0_i32 : i32, i32
  }
}

</mosaic_0001>

<bundles_post_ra>
// kernel: tpu_custom_call.1
= control target key start
LH: loop header
LB: loop body
LE: loop exit
PB: predicated region body
PF: predicated region fallthrough
CT: control target
= control target key end

     0   :  { %s1474_s0 = inlined_call_operand.vmem [shape: f32[8,32], index: 0, kind: input, shape index: {}]   ;;  %s1475_s1 = inlined_call_operand.vmem [shape: f32[32,16], index: 1, kind: input, shape index: {}]   ;;  %s1476_s2 = inlined_call_operand.vmem [shape: f32[1,16], index: 2, kind: input, shape index: {}]   ;;  %s1477_s3 = inlined_call_operand.vmem [shape: f32[16,16], index: 3, kind: input, shape index: {}]   ;;  %s1478_s4 = inlined_call_operand.vmem [shape: f32[1,16], index: 4, kind: input, shape index: {}]   ;;  %s1479_s5 = inlined_call_operand.vmem [shape: f32[16,32], index: 5, kind: input, shape index: {}]   ;;  %s1480_s6 = inlined_call_operand.vmem [shape: f32[1,32], index: 6, kind: input, shape index: {}]   ;;  %s1481_s7 = inlined_call_operand.vmem [shape: f32[32,8], index: 7, kind: input, shape index: {}]   ;;  %s1482_s8 = inlined_call_operand.vmem [shape: f32[1,8], index: 8, kind: input, shape index: {}]   ;;  %s1483_s9 = inlined_call_operand.vmem [shape: f32[8,32], index: 9, kind: input, shape index: {}]   ;;  %s1484_s10 = inlined_call_operand.vmem [shape: f32[1,32], index: 10, kind: input, shape index: {}]   ;;  %s1485_s11 = inlined_call_operand.vmem [shape: f32[32,16], index: 11, kind: input, shape index: {}]   ;;  %s1486_s12 = inlined_call_operand.vmem [shape: f32[1,16], index: 12, kind: input, shape index: {}]   ;;  %s1487_s13 = inlined_call_operand.vmem [shape: f32[16,16], index: 13, kind: input, shape index: {}]   ;;  %s1488_s14 = inlined_call_operand.vmem [shape: f32[1,16], index: 14, kind: input, shape index: {}]   ;;  %s1489_s15 = inlined_call_operand.vmem [shape: f32[16,32], index: 15, kind: input, shape index: {}]   ;;  %s1490_s16 = inlined_call_operand.vmem [shape: f32[1,32], index: 16, kind: input, shape index: {}]   ;;  %s1491_s17 = inlined_call_operand.vmem [shape: f32[32,16], index: 17, kind: input, shape index: {}]   ;;  %s1492_s18 = inlined_call_operand.hbm [shape: f32[8,32], index: 18, kind: output, shape index: {0}]   ;;  %s1493_s19 = inlined_call_operand.hbm [shape: f32[8,16], index: 19, kind: output, shape index: {1}]   ;;  %s1494_s20 = inlined_call_operand.hbm [shape: f32[8,16], index: 20, kind: output, shape index: {2}]   ;;  %s1495_s21 = inlined_call_operand.hbm [shape: f32[8,32], index: 21, kind: output, shape index: {3}]   ;;  %s1496_s22 = inlined_call_operand.hbm [shape: f32[8,8], index: 22, kind: output, shape index: {4}]   ;;  %s1497_s23 = inlined_call_operand.hbm [shape: f32[8,16], index: 23, kind: output, shape index: {5}]  }
   0x1   :  { %1502 = sst [smem:[#allocation16_spill]] %s1474_s0 }
   0x2   :  { %1503 = sst [smem:[#allocation17_spill]] %s1475_s1 }
   0x3   :  { %1504 = sst [smem:[#allocation18_spill]] %s1476_s2 }
   0x4   :  { %1505 = sst [smem:[#allocation19_spill]] %s1477_s3 }
   0x5   :  { %1506 = sst [smem:[#allocation20_spill]] %s1478_s4 }
   0x6   :  { %1507 = sst [smem:[#allocation21_spill]] %s1479_s5 }
   0x7   :  { %1508 = sst [smem:[#allocation22_spill]] %s1480_s6 }
   0x8   :  { %1509 = sst [smem:[#allocation23_spill]] %s1481_s7 }
   0x9   :  { %29 = vsyncpa [#allocation3], 0 }
   0xa   :  { %30 = vsyncpa [#allocation5], 0 }
   0xb   :  { %31 = vsyncpa [#allocation8], 0  ;;  %s1510_s24 = sld [smem:[#allocation17_spill]]  ;;  %v1166_v1 = vmov 0.0   ;;  %vm1167_vm0 = vmmov 0  }
   0xc   :  { %953 = vmatprep.subr.mxu0 %v1166_v1  ;;  %961 = vmatprep.mubr.msk.f32.mxu0 %vm1167_vm0, %v1166_v1 }
   0xd   :  { %964 = vmatprep.subr.mxu1 %v1166_v1 }
  0x11   :  { %v73_v0 = vld [vmem:[%s1510_s24 + $0x18] sm:$0xff]  ;;  %v72_v2 = vld [vmem:[%s1510_s24 + $0x10] sm:$0xff] }
  0x12   :  { %954 = vmatpush3.msra.mxu0 %v73_v0 }
  0x13   :  { %32 = vsyncpa [#allocation11], 0  ;;  %955 = vmatprep.subr.mxu0 %v1166_v1  ;;  %v71_v3 = vld [vmem:[%s1510_s24 + $0x8] sm:$0xff]  ;;  %968 = vmatprep.mubr.msk.f32.mxu1 %vm1167_vm0, %v1166_v1  ;;  %v70_v4 = vld [vmem:[%s1510_s24] sm:$0xff]  ;;  %s1511_s28 = sld [smem:[#allocation16_spill]]  ;;  %vm81_vm1 = vcmask 261120  }
  0x14   :  { %956 = vmatpush3.msra.mxu0 %v72_v2  ;;  %s1512_s0 = sld [smem:[#allocation19_spill]]  ;;  %vm165_vm2 = vcmask 130048   ;;  %v407_v24 = vld [vmem:[%s1483_s9] sm:$0xff]  ;;  %vm415_vm3 = vcmask 64512   ;;  %v493_v33 = vld [vmem:[%s1485_s11 + $0x18] sm:$0xff]  ;;  %v492_v35 = vld [vmem:[%s1485_s11 + $0x10] sm:$0xff] }
  0x15   :  { %957 = vmatprep.subr.mxu0 %v1166_v1  ;;  %s1513_s5 = sld [smem:[#allocation18_spill]]  ;;  %v908_v30 = vld [vmem:[%s1482_s8] ss:$0 sm:$0xff]  ;;  %v491_v36 = vld [vmem:[%s1485_s11 + $0x8] sm:$0xff]  ;;  %v748_v45 = vld [vmem:[%s1491_s17 + $0x18] sm:$0xff]  ;;  %s1169_s26 = smov [#allocation7]  }
  0x16   :  { %958 = vmatpush3.msra.mxu0 %v71_v3  ;;  %s1514_s2 = sld [smem:[#allocation21_spill]]  ;;  %v490_v37 = vld [vmem:[%s1485_s11] sm:$0xff]  ;;  %v576_v43 = vld [vmem:[%s1487_s13 + $0x8] sm:$0xff]  ;;  %v747_v51 = vld [vmem:[%s1491_s17 + $0x10] sm:$0xff] }
  0x17   :  { %959 = vmatprep.subr.mxu0 %v1166_v1  ;;  %s1515_s29 = sld [smem:[#allocation23_spill]]  ;;  %v910_v38 = vld [vmem:[%s1484_s10] ss:$0 sm:$0xff]  ;;  %v659_v52 = vld [vmem:[%s1489_s15 + $0x8] sm:$0xff] }
  0x18   :  { %960 = vmatpush3.msra.mxu0 %v70_v4  ;;  %s1516_s4 = sld [smem:[#allocation20_spill]]  ;;  %v575_v44 = vld [vmem:[%s1487_s13] sm:$0xff]  ;;  %v746_v53 = vld [vmem:[%s1491_s17 + $0x8] sm:$0xff] }
  0x19   :  { %v1317_v5 = vld [vmem:[%s1511_s28] sm:$0xff]  ;;  %978 = vmatprep.subr.mxu0 %v1166_v1  ;;  %s1517_s28 = sld [smem:[#allocation22_spill]] }
  0x1a   :  { %962 = vmatmul.mubr.msk.f32.vlgmr.msra.gmra.mxu0 %vm81_vm1, %v1317_v5  ;;  %v157_v6 = vld [vmem:[%s1512_s0 + $0x8] sm:$0xff]  ;;  %v156_v7 = vld [vmem:[%s1512_s0] sm:$0xff] }
  0x1b   :  { %986 = vmatprep.mubr.msk.f32.mxu0 %vm1167_vm0, %v1166_v1  ;;  %965 = vmatpush3.msra.mxu1 %v157_v6  ;;  %v902_v8 = vld [vmem:[%s1513_s5] ss:$0 sm:$0xff] }
  0x1c   :  { %966 = vmatprep.subr.mxu1 %v1166_v1  ;;  %v241_v13 = vld [vmem:[%s1514_s2 + $0x8] sm:$0xff]  ;;  %v240_v14 = vld [vmem:[%s1514_s2] sm:$0xff]  ;;  %s856_s2 = sshll.u32 %s1169_s26, 4  ;;  %s857_s2 = int_to_ptr.vmem [resolvable:$true] %s856_s2 }
  0x1d   :  { %967 = vmatpush3.msra.mxu1 %v156_v7  ;;  %v326_v15 = vld [vmem:[%s1515_s29 + $0x18] sm:$0xff]  ;;  %v325_v21 = vld [vmem:[%s1515_s29 + $0x10] sm:$0xff]  ;;  %v324_v22 = vld [vmem:[%s1515_s29 + $0x8] sm:$0xff] }
  0x1e   :  { %971 = vmatprep.subr.mxu1 %v1166_v1  ;;  %979 = vmatpush3.msra.mxu0 %v326_v15  ;;  %v904_v16 = vld [vmem:[%s1516_s4] ss:$0 sm:$0xff] }
  0x1f   :  { %980 = vmatprep.subr.mxu0 %v1166_v1  ;;  %v323_v23 = vld [vmem:[%s1515_s29] sm:$0xff] }
  0x20   :  { %981 = vmatpush3.msra.mxu0 %v325_v21  ;;  %v906_v25 = vld [vmem:[%s1517_s28] ss:$0 sm:$0xff] }
  0x21   :  { %982 = vmatprep.subr.mxu0 %v1166_v1  ;;  %v912_v46 = vld [vmem:[%s1486_s12] ss:$0 sm:$0xff] }
  0x22   :  { %983 = vmatpush3.msra.mxu0 %v324_v22  ;;  %v658_v54 = vld [vmem:[%s1489_s15] sm:$0xff]  ;;  %s1168_s15 = smov [#allocation4]  }
  0x23   :  { %984 = vmatprep.subr.mxu0 %v1166_v1  ;;  %v745_v55 = vld [vmem:[%s1491_s17] sm:$0xff]  ;;  %s836_s17 = sshll.u32 %s1168_s15, 4  ;;  %s837_s17 = int_to_ptr.vmem [resolvable:$true] %s836_s17 }
  0x24   :  { %985 = vmatpush3.msra.mxu0 %v323_v23  ;;  %v914_v56 = vld [vmem:[%s1488_s14] ss:$0 sm:$0xff]  ;;  %s1038_s6 = scalar_lea.vmem %s837_s17, 128  ;;  %p1043_p1 = scmp.lt.s32.totalorder %s837_s17, %s837_s17 }
  0x25   :  { %1005 = vmatprep.subr.mxu0 %v1166_v1  ;;  %p1039_p0 = scmp.ne.s32.totalorder %s837_s17, %s1038_s6  ;;  %p1044_p2 = scmp.lt.s32.totalorder %s1038_s6, %s1038_s6 }
  0x27   :  { %p1045_p3 = por %p1044_p2, %p1043_p1 }
  0x29   :  { %p1046_p4 = pnand %p1045_p3, %p1039_p0 }
  0xda   :  { %v151_v9 = vpop.f32.mrf.mxu0 }
  0xdb   :  { %v152_v10 = vadd.f32 %v902_v8, %v151_v9 }
  0xdc   :  { %v963_v11 = vpop.f32.mrf.mxu0 }
  0xdd   :  { %v155_v12 = vmax.f32 %v152_v10, 0.0 }
  0xdf   :  { %969 = vmatmul.mubr.msk.f32.vlgmr.msra.gmra.mxu1 %vm165_vm2, %v155_v12  ;;  %741 = vst.msk [vmem:[#allocation4] sm:$0xff] %vm165_vm2, %v155_v12 }
  0xe0   :  { %975 = vmatprep.mubr.msk.f32.mxu1 %vm1167_vm0, %v1166_v1  ;;  %972 = vmatpush3.msra.mxu1 %v241_v13 }
  0xe1   :  { %973 = vmatprep.subr.mxu1 %v1166_v1 }
  0xe2   :  { %974 = vmatpush3.msra.mxu1 %v240_v14 }
  0xe3   :  { %989 = vmatprep.subr.mxu1 %v1166_v1 }
 0x19f   :  { %v235_v17 = vpop.f32.mrf.mxu1 }
 0x1a0   :  { %v236_v18 = vadd.f32 %v904_v16, %v235_v17 }
 0x1a1   :  { %v970_v19 = vpop.f32.mrf.mxu1 }
 0x1a2   :  { %v239_v20 = vmax.f32 %v236_v18, 0.0 }
 0x1a4   :  { %742 = vst.msk [vmem:[#allocation6] sm:$0xff] %vm165_vm2, %v239_v20  ;;  %976 = vmatmul.mubr.msk.f32.vlgmr.msra.gmra.mxu1 %vm165_vm2, %v239_v20 }
 0x1a5   :  { %991 = vmatprep.mubr.msk.f32.mxu1 %vm1167_vm0, %v1166_v1  ;;  %990 = vmatpush3.msra.mxu1 %v407_v24 }
 0x1a6   :  { %994 = vmatprep.subr.mxu1 %v1166_v1 }
 0x264   :  { %v318_v26 = vpop.f32.mrf.mxu1 }
 0x265   :  { %v319_v27 = vadd.f32 %v906_v25, %v318_v26 }
 0x266   :  { %v977_v28 = vpop.f32.mrf.mxu1 }
 0x267   :  { %v322_v29 = vmax.f32 %v319_v27, 0.0 }
 0x269   :  { %743 = vst.msk [vmem:[#allocation7] sm:$0xff] %vm81_vm1, %v322_v29  ;;  %987 = vmatmul.mubr.msk.f32.vlgmr.msra.gmra.mxu0 %vm81_vm1, %v322_v29 }
 0x26a   :  { %1009 = vmatprep.mubr.msk.f32.mxu0 %vm1167_vm0, %v1166_v1  ;;  %1006 = vmatpush3.msra.mxu0 %v576_v43 }
 0x26b   :  { %1007 = vmatprep.subr.mxu0 %v1166_v1 }
 0x26c   :  { %1008 = vmatpush3.msra.mxu0 %v575_v44 }
 0x26d   :  { %1012 = vmatprep.subr.mxu0 %v1166_v1 }
 0x329   :  { %v403_v31 = vpop.f32.mrf.mxu0 }
 0x32a   :  { %v404_v32 = vadd.f32 %v908_v30, %v403_v31 }
 0x32b   :  { %v988_v34 = vpop.f32.mrf.mxu0 }
 0x32c   :  { %992 = vmatmul.mubr.msk.f32.vlgmr.msra.gmra.mxu1 %vm415_vm3, %v404_v32  ;;  %744 = vst.msk [vmem:[#allocation9] sm:$0xff] %vm415_vm3, %v404_v32 }
 0x32d   :  { %995 = vmatpush3.msra.mxu1 %v493_v33  ;;  %1002 = vmatprep.mubr.msk.f32.mxu1 %vm1167_vm0, %v1166_v1 }
 0x32e   :  { %996 = vmatprep.subr.mxu1 %v1166_v1 }
 0x32f   :  { %997 = vmatpush3.msra.mxu1 %v492_v35 }
 0x330   :  { %998 = vmatprep.subr.mxu1 %v1166_v1 }
 0x331   :  { %999 = vmatpush3.msra.mxu1 %v491_v36 }
 0x332   :  { %1000 = vmatprep.subr.mxu1 %v1166_v1 }
 0x333   :  { %1001 = vmatpush3.msra.mxu1 %v490_v37 }
 0x334   :  { %1019 = vmatprep.subr.mxu1 %v1166_v1 }
 0x3ec   :  { %v485_v39 = vpop.f32.mrf.mxu1 }
 0x3ed   :  { %v486_v40 = vadd.f32 %v910_v38, %v485_v39 }
 0x3ee   :  { %v993_v41 = vpop.f32.mrf.mxu1 }
 0x3ef   :  { %v489_v42 = vmax.f32 %v486_v40, 0.0 }
 0x3f1   :  { %1003 = vmatmul.mubr.msk.f32.vlgmr.msra.gmra.mxu1 %vm81_vm1, %v489_v42 }
 0x3f2   :  { %1027 = vmatprep.mubr.msk.f32.mxu1 %vm1167_vm0, %v1166_v1  ;;  %1020 = vmatpush3.msra.mxu1 %v748_v45 }
 0x3f3   :  { %1021 = vmatprep.subr.mxu1 %v1166_v1 }
 0x3f4   :  { %1022 = vmatpush3.msra.mxu1 %v747_v51 }
 0x3f5   :  { %1023 = vmatprep.subr.mxu1 %v1166_v1 }
 0x3f6   :  { %1024 = vmatpush3.msra.mxu1 %v746_v53 }
 0x3f7   :  { %1025 = vmatprep.subr.mxu1 %v1166_v1 }
 0x3f8   :  { %1026 = vmatpush3.msra.mxu1 %v745_v55 }
 0x3f9   :  { %1028 = vmatmul.mubr.msk.f32.vlgmr.msra.gmra.mxu1 %vm81_vm1, %v1317_v5 }
 0x4b1   :  { %v570_v47 = vpop.f32.mrf.mxu1 }
 0x4b2   :  { %v571_v48 = vadd.f32 %v912_v46, %v570_v47 }
 0x4b3   :  { %v1004_v49 = vpop.f32.mrf.mxu1 }
 0x4b4   :  { %v574_v50 = vmax.f32 %v571_v48, 0.0 }
 0x4b6   :  { %1010 = vmatmul.mubr.msk.f32.vlgmr.msra.gmra.mxu0 %vm165_vm2, %v574_v50 }
 0x4b7   :  { %1016 = vmatprep.mubr.msk.f32.mxu0 %vm1167_vm0, %v1166_v1  ;;  %1013 = vmatpush3.msra.mxu0 %v659_v52 }
 0x4b8   :  { %1014 = vmatprep.subr.mxu0 %v1166_v1 }
 0x4b9   :  { %1015 = vmatpush3.msra.mxu0 %v658_v54  ;;  %v815_v61 = vpop.f32.mrf.mxu1 }
 0x4ba   :  { %819 = vst.msk [vmem:[#allocation10] sm:$0xff] %vm165_vm2, %v815_v61 }
 0x4bb   :  { %v1029_v62 = vpop.f32.mrf.mxu1 }
 0x576   :  { %v653_v57 = vpop.f32.mrf.mxu0 }
 0x577   :  { %v654_v58 = vadd.f32 %v914_v56, %v653_v57 }
 0x578   :  { %v1011_v59 = vpop.f32.mrf.mxu0 }
 0x579   :  { %v657_v60 = vmax.f32 %v654_v58, 0.0 }
 0x57b   :  { %1017 = vmatmul.mubr.msk.f32.vlgmr.msra.gmra.mxu0 %vm165_vm2, %v657_v60 }
 0x57c   :  { %1049 = shalt.err (!%p1046_p4)
}
 0x57d   :  { %839 = dma.vmem_to_hbm [thread:$0]  %s837_s17, 128, %s1493_s19, [#allocation5]  }
 0x57e   :  { %s1058_s27 = scalar_lea.vmem %s857_s2, 128  ;;  %p1063_p6 = scmp.lt.s32.totalorder %s857_s2, %s857_s2 }
 0x57f   :  { %p1059_p5 = scmp.ne.s32.totalorder %s857_s2, %s1058_s27  ;;  %p1064_p7 = scmp.lt.s32.totalorder %s1058_s27, %s1058_s27 }
 0x581   :  { %p1065_p8 = por %p1064_p7, %p1063_p6 }
 0x583   :  { %p1066_p9 = pnand %p1065_p8, %p1059_p5 }
 0x585   :  { %1069 = shalt.err (!%p1066_p9)
}
 0x586   :  { %859 = dma.vmem_to_hbm [thread:$0]  %s857_s2, 128, %s1495_s21, [#allocation8]  }
 0x587   :  { %s1170_s28 = smov [#allocation6]  }
 0x588   :  { %s846_s9 = sshll.u32 %s1170_s28, 4  ;;  %s847_s9 = int_to_ptr.vmem [resolvable:$true] %s846_s9 }
 0x589   :  { %s1078_s13 = scalar_lea.vmem %s847_s9, 128  ;;  %p1083_p11 = scmp.lt.s32.totalorder %s847_s9, %s847_s9 }
 0x58a   :  { %p1079_p10 = scmp.ne.s32.totalorder %s847_s9, %s1078_s13  ;;  %p1084_p12 = scmp.lt.s32.totalorder %s1078_s13, %s1078_s13 }
 0x58c   :  { %p1085_p13 = por %p1084_p12, %p1083_p11 }
 0x58e   :  { %p1086_p0 = pnand %p1085_p13, %p1079_p10 }
 0x590   :  { %1089 = shalt.err (!%p1086_p0)
}
 0x591   :  { %849 = dma.vmem_to_hbm [thread:$0]  %s847_s9, 128, %s1494_s20, [#allocation5]  }
 0x592   :  { %s1171_s3 = smov [#allocation9]   ;;  %s1172_s12 = smov [#allocation10]  }
 0x593   :  { %s866_s0 = sshll.u32 %s1171_s3, 4  ;;  %s876_s4 = sshll.u32 %s1172_s12, 4  ;;  %s867_s0 = int_to_ptr.vmem [resolvable:$true] %s866_s0  ;;  %s877_s4 = int_to_ptr.vmem [resolvable:$true] %s876_s4 }
 0x594   :  { %s1098_s21 = scalar_lea.vmem %s867_s0, 128  ;;  %p1103_p2 = scmp.lt.s32.totalorder %s867_s0, %s867_s0 }
 0x595   :  { %p1099_p1 = scmp.ne.s32.totalorder %s867_s0, %s1098_s21  ;;  %p1104_p3 = scmp.lt.s32.totalorder %s1098_s21, %s1098_s21 }
 0x597   :  { %p1105_p4 = por %p1104_p3, %p1103_p2 }
 0x599   :  { %p1106_p5 = pnand %p1105_p4, %p1099_p1 }
 0x59b   :  { %1109 = shalt.err (!%p1106_p5)
}
 0x59c   :  { %869 = dma.vmem_to_hbm [thread:$0]  %s867_s0, 128, %s1496_s22, [#allocation8]  }
 0x59d   :  { %s1118_s24 = scalar_lea.vmem %s877_s4, 128  ;;  %p1123_p7 = scmp.lt.s32.totalorder %s877_s4, %s877_s4 }
 0x59e   :  { %p1119_p6 = scmp.ne.s32.totalorder %s877_s4, %s1118_s24  ;;  %p1124_p8 = scmp.lt.s32.totalorder %s1118_s24, %s1118_s24 }
 0x5a0   :  { %p1125_p9 = por %p1124_p8, %p1123_p7 }
 0x5a2   :  { %p1126_p10 = pnand %p1125_p9, %p1119_p6 }
 0x5a4   :  { %1129 = shalt.err (!%p1126_p10)
}
 0x5a5   :  { %879 = dma.vmem_to_hbm [thread:$0]  %s877_s4, 128, %s1497_s23, [#allocation11]   ;;  %v916_v63 = vld [vmem:[%s1490_s16] ss:$0 sm:$0xff] }
 0x5a6   :  { %s1173_s15 = smov [#allocation2]  }
 0x5a7   :  { %s826_s17 = sshll.u32 %s1173_s15, 4  ;;  %s827_s17 = int_to_ptr.vmem [resolvable:$true] %s826_s17 }
 0x5a8   :  { %s1138_s22 = scalar_lea.vmem %s827_s17, 128  ;;  %p1143_p12 = scmp.lt.s32.totalorder %s827_s17, %s827_s17 }
 0x5a9   :  { %p1139_p11 = scmp.ne.s32.totalorder %s827_s17, %s1138_s22  ;;  %p1144_p13 = scmp.lt.s32.totalorder %s1138_s22, %s1138_s22 }
 0x5ab   :  { %p1145_p0 = por %p1144_p13, %p1143_p12 }
 0x5ad   :  { %p1146_p1 = pnand %p1145_p0, %p1139_p11 }
 0x63b   :  { %v736_v0 = vpop.f32.mrf.mxu0 }
 0x63c   :  { %v737_v1 = vadd.f32 %v916_v63, %v736_v0 }
 0x63d   :  { %v1018_v2 = vpop.f32.mrf.mxu0 }
 0x63e   :  { %740 = vst.msk [vmem:[#allocation2] sm:$0xff] %vm81_vm1, %v737_v1 }
 0x63f   :  { %1149 = shalt.err (!%p1146_p1)
}
 0x640   :  { %829 = dma.vmem_to_hbm [thread:$0]  %s827_s17, 128, %s1492_s18, [#allocation3]  }
 0x641   :  { %1158 = dma.done.wait [#allocation3], 128  }
 0x642   :  { %1159 = vsyncadd [#allocation3], 4294967168 }
 0x643   :  { %1160 = dma.done.wait [#allocation5], 256  }
 0x644   :  { %1161 = vsyncadd [#allocation5], 4294967040 }
 0x645   :  { %1162 = dma.done.wait [#allocation8], 256  }
 0x646   :  { %1163 = vsyncadd [#allocation8], 4294967040 }
 0x647   :  { %1164 = dma.done.wait [#allocation11], 128  }
 0x648   :  { %1165 = vsyncadd [#allocation11], 4294967168 }
 0x649   :  { %898 = vsyncpa [#allocation3], 1 }
 0x64a   :  { %899 = vsyncpa [#allocation5], 1 }
 0x64b   :  { %900 = vsyncpa [#allocation8], 1 }
 0x64c   :  { %901 = vsyncpa [#allocation11], 1 }

</bundles_post_ra>
